<compile_context>
chip_gen: v7x
topology: tpu7x:2x2x1
jax: 0.10.0
libtpu: 0.0.40
codegen_flags: <defaults>
</compile_context>

<pallas_src>
import jax
import jax.numpy as jnp
from jax.experimental import pallas as pl
from jax.experimental.pallas import tpu as pltpu

EPS = 1e-5


def _round_up(v: int, m: int) -> int:
    return (v + m - 1) // m * m


def make_head_kernel(num_bn_layers: int):
    """Kernel: x, [w_i, gamma_i, beta_i] * num_bn_layers, w_head, b_head, o."""

    def kernel(*refs):
        x_ref = refs[0]
        o_ref = refs[-1]

        h = x_ref[...]                      # (N, F_pad) float32
        inv_n = 1.0 / h.shape[0]            # static batch size

        idx = 1
        for _ in range(num_bn_layers):
            w_ref, g_ref, b_ref = refs[idx], refs[idx + 1], refs[idx + 2]
            idx += 3

            # Linear (no bias) on the MXU, f32 accumulation.
            y = jnp.dot(h, w_ref[...], preferred_element_type=jnp.float32)

            # BatchNorm1d (training mode, biased variance) -- one pass over y.
            s = jnp.sum(y, axis=0, keepdims=True)            # (1, out_pad)
            ss = jnp.sum(y * y, axis=0, keepdims=True)       # (1, out_pad)
            mean = s * inv_n
            var = jnp.maximum(ss * inv_n - mean * mean, 0.0)
            scale = g_ref[...] * jax.lax.rsqrt(var + EPS)    # gamma folded in (EUP)
            shift = b_ref[...] - mean * scale

            # Affine + ReLU.
            h = jnp.maximum(y * scale + shift, 0.0)

        # Final head: Linear with bias.
        wh_ref, bh_ref = refs[idx], refs[idx + 1]
        out = jnp.dot(h, wh_ref[...], preferred_element_type=jnp.float32) + bh_ref[...]
        o_ref[...] = out.astype(o_ref.dtype)

    return kernel


def keypoint_head(x, bn_layers, head_w, head_b):
    """Fused MLP head of KeyPointModel.

    x:         (N, F) flattened backbone features, float32.
    bn_layers: list of (w, gamma, beta) per LinearBNAct; w is pre-transposed (in, out).
    head_w:    (hidden, 2*num_pt) pre-transposed final Linear weight.
    head_b:    (2*num_pt,) final Linear bias.
    """
    n, f = x.shape
    out_dim = head_w.shape[1]
    out_pad = _round_up(out_dim, 128)

    def pad_cols(a, target):
        pad = target - a.shape[-1]
        if pad == 0:
            return a
        return jnp.pad(a, [(0, 0)] * (a.ndim - 1) + [(0, pad)])

    f_pad = _round_up(f, 128)
    args = [pad_cols(x, f_pad)]

    prev = f_pad
    for (w, g, b) in bn_layers:
        in_d, out_d = w.shape
        od_pad = _round_up(out_d, 128)
        args.append(jnp.pad(w, ((0, prev - in_d), (0, od_pad - out_d))))
        args.append(pad_cols(g.reshape(1, -1), od_pad))
        args.append(pad_cols(b.reshape(1, -1), od_pad))
        prev = od_pad

    args.append(jnp.pad(head_w, ((0, prev - head_w.shape[0]), (0, out_pad - out_dim))))
    args.append(pad_cols(head_b.reshape(1, -1), out_pad))

    vmem_spec = pl.BlockSpec(memory_space=pltpu.MemorySpace.VMEM)

    out_padded = pl.pallas_call(
        make_head_kernel(len(bn_layers)),
        out_shape=jax.ShapeDtypeStruct((n, out_pad), x.dtype),
        in_specs=[vmem_spec] * len(args),
        out_specs=vmem_spec,
    )(*args)

    return out_padded[:, :out_dim]


def reference_head(x, bn_layers, head_w, head_b):
    """Pure-JAX reference (two-pass BN, training-mode batch stats)."""
    h = x
    for (w, g, b) in bn_layers:
        y = h @ w
        mean = y.mean(axis=0, keepdims=True)
        var = ((y - mean) ** 2).mean(axis=0, keepdims=True)
        h = jnp.maximum((y - mean) / jnp.sqrt(var + EPS) * g + b, 0.0)
    return h @ head_w + head_b


if __name__ == "__main__":
    key = jax.random.PRNGKey(0)
    k_x, k_w1, k_w2, k_wh, k_bh = jax.random.split(key, 5)

    # Small shapes consistent with the module's head:
    #   batch N=8, flattened backbone features F=128, hidden_dim=128,
    #   num_hidden=2 (two LinearBNAct layers), num_pt=4 -> head output 2*num_pt=8.
    N, F, HIDDEN, NUM_PT = 8, 128, 128, 4
    OUT = 2 * NUM_PT

    x = jax.random.normal(k_x, (N, F), dtype=jnp.float32)

    # Weights stored pre-transposed (in_dim, out_dim); PyTorch-style uniform init.
    def linear_w(k, in_d, out_d):
        bound = 1.0 / jnp.sqrt(in_d)
        return jax.random.uniform(k, (in_d, out_d), jnp.float32, -bound, bound)

    bn_layers = [
        (linear_w(k_w1, F, HIDDEN),
         jnp.ones((HIDDEN,), jnp.float32), jnp.zeros((HIDDEN,), jnp.float32)),
        (linear_w(k_w2, HIDDEN, HIDDEN),
         jnp.ones((HIDDEN,), jnp.float32), jnp.zeros((HIDDEN,), jnp.float32)),
    ]
    head_w = linear_w(k_wh, HIDDEN, OUT)
    bound_h = 1.0 / jnp.sqrt(HIDDEN)
    head_b = jax.random.uniform(k_bh, (OUT,), jnp.float32, -bound_h, bound_h)

    out = keypoint_head(x, bn_layers, head_w, head_b)
    out = jax.block_until_ready(out)

    ref = reference_head(x, bn_layers, head_w, head_b)
    assert out.shape == (N, OUT), f"bad output shape {out.shape}"
    assert jnp.allclose(out, ref, atol=2e-4, rtol=2e-4), "mismatch vs reference"

    print("KERNEL_OK")
</pallas_src>

<mosaic_0001>
module attributes {stable_mosaic.version = 11 : i64} {
  func.func @kernel(%arg0: memref<8x128xf32, #tpu.memory_space<vmem>>, %arg1: memref<128x128xf32, #tpu.memory_space<vmem>>, %arg2: memref<1x128xf32, #tpu.memory_space<vmem>>, %arg3: memref<1x128xf32, #tpu.memory_space<vmem>>, %arg4: memref<128x128xf32, #tpu.memory_space<vmem>>, %arg5: memref<1x128xf32, #tpu.memory_space<vmem>>, %arg6: memref<1x128xf32, #tpu.memory_space<vmem>>, %arg7: memref<128x128xf32, #tpu.memory_space<vmem>>, %arg8: memref<1x128xf32, #tpu.memory_space<vmem>>, %arg9: memref<8x128xf32, #tpu.memory_space<vmem>>) attributes {dimension_semantics = [], scalar_prefetch = 0 : i64, scratch_operands = 0 : i64, tpu.core_type = #tpu.core_type<tc>} {
    %c0 = arith.constant 0 : index
    %c0_0 = arith.constant 0 : index
    %0 = vector.load %arg0[%c0, %c0_0] : memref<8x128xf32, #tpu.memory_space<vmem>>, vector<8x128xf32>
    %c0_1 = arith.constant 0 : index
    %c0_2 = arith.constant 0 : index
    %1 = vector.load %arg1[%c0_1, %c0_2] : memref<128x128xf32, #tpu.memory_space<vmem>>, vector<128x128xf32>
    %cst = arith.constant dense<0.000000e+00> : vector<8x128xf32>
    %2 = tpu.matmul %0, %1, %cst {dimension_numbers = #tpu.dot_dimension_numbers<[1], [0], [0], [1], [0, 0, 1, 1], [], []>} : vector<8x128xf32>, vector<128x128xf32>, vector<8x128xf32> -> vector<8x128xf32>
    %cst_3 = arith.constant dense<0.000000e+00> : vector<128xf32>
    %3 = vector.multi_reduction <add>, %2, %cst_3 [0] : vector<8x128xf32> to vector<128xf32>
    %4 = vector.shape_cast %3 : vector<128xf32> to vector<1x128xf32>
    %5 = arith.mulf %2, %2 : vector<8x128xf32>
    %cst_4 = arith.constant dense<0.000000e+00> : vector<128xf32>
    %6 = vector.multi_reduction <add>, %5, %cst_4 [0] : vector<8x128xf32> to vector<128xf32>
    %7 = vector.shape_cast %6 : vector<128xf32> to vector<1x128xf32>
    %cst_5 = arith.constant 1.250000e-01 : f32
    %8 = vector.broadcast %cst_5 : f32 to vector<1x128xf32>
    %9 = arith.mulf %4, %8 : vector<1x128xf32>
    %cst_6 = arith.constant 1.250000e-01 : f32
    %10 = vector.broadcast %cst_6 : f32 to vector<1x128xf32>
    %11 = arith.mulf %7, %10 : vector<1x128xf32>
    %12 = arith.mulf %9, %9 : vector<1x128xf32>
    %13 = arith.subf %11, %12 : vector<1x128xf32>
    %cst_7 = arith.constant 0.000000e+00 : f32
    %14 = vector.broadcast %cst_7 : f32 to vector<1x128xf32>
    %15 = arith.maximumf %13, %14 : vector<1x128xf32>
    %c0_8 = arith.constant 0 : index
    %c0_9 = arith.constant 0 : index
    %16 = vector.load %arg2[%c0_8, %c0_9] : memref<1x128xf32, #tpu.memory_space<vmem>>, vector<1x128xf32>
    %cst_10 = arith.constant 9.99999974E-6 : f32
    %17 = vector.broadcast %cst_10 : f32 to vector<1x128xf32>
    %18 = arith.addf %15, %17 : vector<1x128xf32>
    %19 = math.rsqrt %18 : vector<1x128xf32>
    %20 = arith.mulf %16, %19 : vector<1x128xf32>
    %c0_11 = arith.constant 0 : index
    %c0_12 = arith.constant 0 : index
    %21 = vector.load %arg3[%c0_11, %c0_12] : memref<1x128xf32, #tpu.memory_space<vmem>>, vector<1x128xf32>
    %22 = arith.mulf %9, %20 : vector<1x128xf32>
    %23 = arith.subf %21, %22 : vector<1x128xf32>
    %24 = vector.broadcast %20 : vector<1x128xf32> to vector<8x128xf32>
    %25 = arith.mulf %2, %24 : vector<8x128xf32>
    %26 = vector.broadcast %23 : vector<1x128xf32> to vector<8x128xf32>
    %27 = arith.addf %25, %26 : vector<8x128xf32>
    %cst_13 = arith.constant 0.000000e+00 : f32
    %28 = vector.broadcast %cst_13 : f32 to vector<8x128xf32>
    %29 = arith.maximumf %27, %28 : vector<8x128xf32>
    %c0_14 = arith.constant 0 : index
    %c0_15 = arith.constant 0 : index
    %30 = vector.load %arg4[%c0_14, %c0_15] : memref<128x128xf32, #tpu.memory_space<vmem>>, vector<128x128xf32>
    %cst_16 = arith.constant dense<0.000000e+00> : vector<8x128xf32>
    %31 = tpu.matmul %29, %30, %cst_16 {dimension_numbers = #tpu.dot_dimension_numbers<[1], [0], [0], [1], [0, 0, 1, 1], [], []>} : vector<8x128xf32>, vector<128x128xf32>, vector<8x128xf32> -> vector<8x128xf32>
    %cst_17 = arith.constant dense<0.000000e+00> : vector<128xf32>
    %32 = vector.multi_reduction <add>, %31, %cst_17 [0] : vector<8x128xf32> to vector<128xf32>
    %33 = vector.shape_cast %32 : vector<128xf32> to vector<1x128xf32>
    %34 = arith.mulf %31, %31 : vector<8x128xf32>
    %cst_18 = arith.constant dense<0.000000e+00> : vector<128xf32>
    %35 = vector.multi_reduction <add>, %34, %cst_18 [0] : vector<8x128xf32> to vector<128xf32>
    %36 = vector.shape_cast %35 : vector<128xf32> to vector<1x128xf32>
    %cst_19 = arith.constant 1.250000e-01 : f32
    %37 = vector.broadcast %cst_19 : f32 to vector<1x128xf32>
    %38 = arith.mulf %33, %37 : vector<1x128xf32>
    %cst_20 = arith.constant 1.250000e-01 : f32
    %39 = vector.broadcast %cst_20 : f32 to vector<1x128xf32>
    %40 = arith.mulf %36, %39 : vector<1x128xf32>
    %41 = arith.mulf %38, %38 : vector<1x128xf32>
    %42 = arith.subf %40, %41 : vector<1x128xf32>
    %cst_21 = arith.constant 0.000000e+00 : f32
    %43 = vector.broadcast %cst_21 : f32 to vector<1x128xf32>
    %44 = arith.maximumf %42, %43 : vector<1x128xf32>
    %c0_22 = arith.constant 0 : index
    %c0_23 = arith.constant 0 : index
    %45 = vector.load %arg5[%c0_22, %c0_23] : memref<1x128xf32, #tpu.memory_space<vmem>>, vector<1x128xf32>
    %cst_24 = arith.constant 9.99999974E-6 : f32
    %46 = vector.broadcast %cst_24 : f32 to vector<1x128xf32>
    %47 = arith.addf %44, %46 : vector<1x128xf32>
    %48 = math.rsqrt %47 : vector<1x128xf32>
    %49 = arith.mulf %45, %48 : vector<1x128xf32>
    %c0_25 = arith.constant 0 : index
    %c0_26 = arith.constant 0 : index
    %50 = vector.load %arg6[%c0_25, %c0_26] : memref<1x128xf32, #tpu.memory_space<vmem>>, vector<1x128xf32>
    %51 = arith.mulf %38, %49 : vector<1x128xf32>
    %52 = arith.subf %50, %51 : vector<1x128xf32>
    %53 = vector.broadcast %49 : vector<1x128xf32> to vector<8x128xf32>
    %54 = arith.mulf %31, %53 : vector<8x128xf32>
    %55 = vector.broadcast %52 : vector<1x128xf32> to vector<8x128xf32>
    %56 = arith.addf %54, %55 : vector<8x128xf32>
    %cst_27 = arith.constant 0.000000e+00 : f32
    %57 = vector.broadcast %cst_27 : f32 to vector<8x128xf32>
    %58 = arith.maximumf %56, %57 : vector<8x128xf32>
    %c0_28 = arith.constant 0 : index
    %c0_29 = arith.constant 0 : index
    %59 = vector.load %arg7[%c0_28, %c0_29] : memref<128x128xf32, #tpu.memory_space<vmem>>, vector<128x128xf32>
    %cst_30 = arith.constant dense<0.000000e+00> : vector<8x128xf32>
    %60 = tpu.matmul %58, %59, %cst_30 {dimension_numbers = #tpu.dot_dimension_numbers<[1], [0], [0], [1], [0, 0, 1, 1], [], []>} : vector<8x128xf32>, vector<128x128xf32>, vector<8x128xf32> -> vector<8x128xf32>
    %c0_31 = arith.constant 0 : index
    %c0_32 = arith.constant 0 : index
    %61 = vector.load %arg8[%c0_31, %c0_32] : memref<1x128xf32, #tpu.memory_space<vmem>>, vector<1x128xf32>
    %62 = vector.broadcast %61 : vector<1x128xf32> to vector<8x128xf32>
    %63 = arith.addf %60, %62 : vector<8x128xf32>
    %c0_33 = arith.constant 0 : index
    %c0_34 = arith.constant 0 : index
    %64 = vector.load %arg9[%c0_33, %c0_34] : memref<8x128xf32, #tpu.memory_space<vmem>>, vector<8x128xf32>
    tpu.vector_store %arg9[%c0_33, %c0_34], %63 {strides = array<i32>} : memref<8x128xf32, #tpu.memory_space<vmem>>, vector<8x128xf32>,
    return
  }
}

</mosaic_0001>

<bundles_post_ra>
// kernel: tpu_custom_call.1
= control target key start
LH: loop header
LB: loop body
LE: loop exit
PB: predicated region body
PF: predicated region fallthrough
CT: control target
= control target key end

     0   :  { %14 = vsyncpa [#allocation3], 0  ;;  %s988_s0 = inlined_call_operand.hbm [shape: f32[8,128], index: 0, kind: input, shape index: {}]   ;;  %s989_s1 = inlined_call_operand.hbm [shape: f32[128,128], index: 1, kind: input, shape index: {}]   ;;  %s990_s2 = inlined_call_operand.vmem [shape: f32[1,128], index: 2, kind: input, shape index: {}]   ;;  %s991_s3 = inlined_call_operand.vmem [shape: f32[1,128], index: 3, kind: input, shape index: {}]   ;;  %s992_s4 = inlined_call_operand.hbm [shape: f32[128,128], index: 4, kind: input, shape index: {}]   ;;  %s993_s5 = inlined_call_operand.vmem [shape: f32[1,128], index: 5, kind: input, shape index: {}]   ;;  %s994_s6 = inlined_call_operand.vmem [shape: f32[1,128], index: 6, kind: input, shape index: {}]   ;;  %s995_s7 = inlined_call_operand.hbm [shape: f32[128,128], index: 7, kind: input, shape index: {}]   ;;  %s996_s8 = inlined_call_operand.vmem [shape: f32[1,128], index: 8, kind: input, shape index: {}]   ;;  %s997_s9 = inlined_call_operand.hbm [shape: f32[8,128], index: 9, kind: output, shape index: {}]  }
   0x1   :  { %15 = vsyncpa [#allocation6], 0 }
   0x2   :  { %16 = vsyncpa [#allocation9], 0 }
   0x3   :  { %17 = vsyncpa [#allocation4], 0  ;;  %s811_s30 = smov [#allocation5]   ;;  %s693_s13 = scalar_lea.hbm %s989_s1, 2048 }
   0x4   :  { %s33_s10 = sshll.u32 %s811_s30, 4  ;;  %p694_p0 = scmp.ne.s32.totalorder %s989_s1, %s693_s13  ;;  %s34_s10 = int_to_ptr.vmem [resolvable:$true] %s33_s10 }
   0x5   :  { %p697_p1 = scmp.lt.u32.totalorder %s693_s13, %s989_s1 }
   0x7   :  { %p699_p2 = pnand %p697_p1, %p694_p0 }
   0x9   :  { %702 = shalt.err (!%p699_p2)
}
   0xa   :  { %s703_s18 = scalar_lea.vmem %s34_s10, 2048  ;;  %p708_p4 = scmp.lt.s32.totalorder %s34_s10, %s34_s10 }
   0xb   :  { %p704_p3 = scmp.ne.s32.totalorder %s34_s10, %s703_s18  ;;  %p709_p5 = scmp.lt.s32.totalorder %s703_s18, %s703_s18 }
   0xd   :  { %p710_p6 = por %p709_p5, %p708_p4 }
   0xf   :  { %p711_p7 = pnand %p710_p6, %p704_p3 }
  0x11   :  { %714 = shalt.err (!%p711_p7)
}
  0x12   :  { %s812_s19 = smov 128   ;;  %s813_s20 = smov 8  }
  0x13   :  { %39 = dma.hbm_to_vmem [thread:$0]  %s989_s1, 2048, %s34_s10, [#allocation6], %s812_s19, %s812_s19, %s813_s20  }
  0x14   :  { %s814_s23 = smov [#allocation2]   ;;  %s815_s25 = smov [#allocation7]  }
  0x15   :  { %s24_s24 = sshll.u32 %s814_s23, 4  ;;  %s49_s26 = sshll.u32 %s815_s25, 4  ;;  %s25_s24 = int_to_ptr.vmem [resolvable:$true] %s24_s24  ;;  %s50_s26 = int_to_ptr.vmem [resolvable:$true] %s49_s26 }
  0x16   :  { %s715_s29 = scalar_lea.hbm %s988_s0, 128 }
  0x17   :  { %p716_p8 = scmp.ne.s32.totalorder %s988_s0, %s715_s29  ;;  %p719_p9 = scmp.lt.u32.totalorder %s715_s29, %s988_s0 }
  0x19   :  { %p721_p10 = pnand %p719_p9, %p716_p8 }
  0x1b   :  { %724 = shalt.err (!%p721_p10)
}
  0x1c   :  { %s725_s1 = scalar_lea.vmem %s25_s24, 128  ;;  %p730_p12 = scmp.lt.s32.totalorder %s25_s24, %s25_s24 }
  0x1d   :  { %p726_p11 = scmp.ne.s32.totalorder %s25_s24, %s725_s1  ;;  %p731_p13 = scmp.lt.s32.totalorder %s725_s1, %s725_s1 }
  0x1f   :  { %p732_p0 = por %p731_p13, %p730_p12 }
  0x21   :  { %p733_p1 = pnand %p732_p0, %p726_p11 }
  0x23   :  { %736 = shalt.err (!%p733_p1)
}
  0x24   :  { %27 = dma.hbm_to_vmem [thread:$0]  %s988_s0, 128, %s25_s24, [#allocation3]  }
  0x25   :  { %s737_s17 = scalar_lea.hbm %s992_s4, 2048 }
  0x26   :  { %p738_p2 = scmp.ne.s32.totalorder %s992_s4, %s737_s17  ;;  %p741_p3 = scmp.lt.u32.totalorder %s737_s17, %s992_s4 }
  0x28   :  { %p743_p4 = pnand %p741_p3, %p738_p2 }
  0x2a   :  { %746 = shalt.err (!%p743_p4)
}
  0x2b   :  { %s747_s25 = scalar_lea.vmem %s50_s26, 2048  ;;  %p752_p6 = scmp.lt.s32.totalorder %s50_s26, %s50_s26 }
  0x2c   :  { %p748_p5 = scmp.ne.s32.totalorder %s50_s26, %s747_s25  ;;  %p753_p7 = scmp.lt.s32.totalorder %s747_s25, %s747_s25 }
  0x2e   :  { %p754_p8 = por %p753_p7, %p752_p6 }
  0x30   :  { %p755_p9 = pnand %p754_p8, %p748_p5 }
  0x32   :  { %758 = shalt.err (!%p755_p9)
}
  0x33   :  { %55 = dma.hbm_to_vmem [thread:$0]  %s992_s4, 2048, %s50_s26, [#allocation6], %s812_s19, %s812_s19, %s813_s20  }
  0x34   :  { %s816_s27 = smov [#allocation8]   ;;  %s759_s11 = scalar_lea.hbm %s995_s7, 2048 }
  0x35   :  { %s65_s28 = sshll.u32 %s816_s27, 4  ;;  %p760_p10 = scmp.ne.s32.totalorder %s995_s7, %s759_s11  ;;  %s66_s28 = int_to_ptr.vmem [resolvable:$true] %s65_s28 }
  0x36   :  { %p763_p11 = scmp.lt.u32.totalorder %s759_s11, %s995_s7 }
  0x38   :  { %p765_p12 = pnand %p763_p11, %p760_p10 }
  0x3a   :  { %768 = shalt.err (!%p765_p12)
}
  0x3b   :  { %s769_s14 = scalar_lea.vmem %s66_s28, 2048  ;;  %p774_p0 = scmp.lt.s32.totalorder %s66_s28, %s66_s28 }
  0x3c   :  { %p770_p13 = scmp.ne.s32.totalorder %s66_s28, %s769_s14  ;;  %p775_p1 = scmp.lt.s32.totalorder %s769_s14, %s769_s14 }
  0x3e   :  { %p776_p2 = por %p775_p1, %p774_p0 }
  0x40   :  { %p777_p3 = pnand %p776_p2, %p770_p13 }
  0x42   :  { %780 = shalt.err (!%p777_p3)
}
  0x43   :  { %71 = dma.hbm_to_vmem [thread:$0]  %s995_s7, 2048, %s66_s28, [#allocation9], %s812_s19, %s812_s19, %s813_s20  }
  0x44   :  { %803 = dma.done.wait [#allocation3], 128  }
  0x45   :  { %804 = vsyncadd [#allocation3], 4294967168 }
  0x46   :  { %805 = dma.done.wait [#allocation6], 4096  }
  0x47   :  { %806 = vsyncadd [#allocation6], 4294963200 }
  0x48   :  { %807 = dma.done.wait [#allocation9], 2048  }
  0x49   :  { %808 = vsyncadd [#allocation9], 4294965248  ;;  %v817_v0 = vmov 0.0|0.0   ;;  %vm818_vm0 = vmmov 0   ;;  %v819_v1 = vmov 0.0   ;;  %v87_v2 = vld [vmem:[#allocation5] sm:$0xff] }
  0x4a   :  { %607 = vmatprep.subr.bf16.mxu0 %v817_v0  ;;  %534 = vmatprep.mubr.msk.f32.mxu0 %vm818_vm0, %v819_v1  ;;  %v88_v3 = vld [vmem:[#allocation5 + $0x8] sm:$0xff]  ;;  %v89_v4 = vld [vmem:[#allocation5 + $0x10] sm:$0xff]  ;;  %v90_v6 = vld [vmem:[#allocation5 + $0x18] sm:$0xff] }
  0x4b   :  { %631 = vmatprep.subr.bf16.mxu1 %v817_v0  ;;  %569 = vmatprep.mubr.msk.f32.mxu1 %vm818_vm0, %v819_v1  ;;  %v608_v5 = vpack.c.bf16 %v88_v3, %v87_v2  ;;  %v611_v7 = vpack.c.bf16 %v90_v6, %v89_v4  ;;  %v91_v8 = vld [vmem:[#allocation5 + $0x20] sm:$0xff]  ;;  %v92_v9 = vld [vmem:[#allocation5 + $0x28] sm:$0xff]  ;;  %v93_v11 = vld [vmem:[#allocation5 + $0x30] sm:$0xff] }
  0x4c   :  { %v614_v10 = vpack.c.bf16 %v92_v9, %v91_v8  ;;  %v94_v12 = vld [vmem:[#allocation5 + $0x38] sm:$0xff]  ;;  %v95_v14 = vld [vmem:[#allocation5 + $0x40] sm:$0xff]  ;;  %v96_v15 = vld [vmem:[#allocation5 + $0x48] sm:$0xff]  ;;  %v199_v9 = vlaneseq }
  0x4d   :  { %609 = vmatpush3.bf16.msra.mxu0 %v608_v5  ;;  %v617_v13 = vpack.c.bf16 %v94_v12, %v93_v11  ;;  %v620_v16 = vpack.c.bf16 %v96_v15, %v95_v14  ;;  %v97_v17 = vld [vmem:[#allocation5 + $0x50] sm:$0xff]  ;;  %v98_v18 = vld [vmem:[#allocation5 + $0x58] sm:$0xff]  ;;  %v99_v20 = vld [vmem:[#allocation5 + $0x60] sm:$0xff] }
  0x4e   :  { %610 = vmatprep.subr.bf16.mxu0 %v817_v0  ;;  %v623_v19 = vpack.c.bf16 %v98_v18, %v97_v17  ;;  %v100_v21 = vld [vmem:[#allocation5 + $0x68] sm:$0xff]  ;;  %v101_v23 = vld [vmem:[#allocation5 + $0x70] sm:$0xff]  ;;  %v102_v24 = vld [vmem:[#allocation5 + $0x78] sm:$0xff] }
  0x4f   :  { %v626_v22 = vpack.c.bf16 %v100_v21, %v99_v20  ;;  %v629_v25 = vpack.c.bf16 %v102_v24, %v101_v23  ;;  %v86_v26 = vld [vmem:[#allocation2] sm:$0xff]  ;;  %v213_v27 = vld [vmem:[#allocation7] sm:$0xff]  ;;  %v214_v28 = vld [vmem:[#allocation7 + $0x8] sm:$0xff] }
  0x50   :  { %v632_v29 = vpack.c.bf16 %v214_v28, %v213_v27  ;;  %v215_v30 = vld [vmem:[#allocation7 + $0x10] sm:$0xff]  ;;  %v216_v31 = vld [vmem:[#allocation7 + $0x18] sm:$0xff]  ;;  %v217_v33 = vld [vmem:[#allocation7 + $0x20] sm:$0xff] }
  0x51   :  { %612 = vmatpush3.bf16.msra.mxu0 %v611_v7  ;;  %v635_v32 = vpack.c.bf16 %v216_v31, %v215_v30  ;;  %v218_v34 = vld [vmem:[#allocation7 + $0x28] sm:$0xff]  ;;  %v219_v36 = vld [vmem:[#allocation7 + $0x30] sm:$0xff]  ;;  %v220_v37 = vld [vmem:[#allocation7 + $0x38] sm:$0xff] }
  0x52   :  { %613 = vmatprep.subr.bf16.mxu0 %v817_v0  ;;  %633 = vmatpush3.bf16.msra.mxu1 %v632_v29  ;;  %v638_v35 = vpack.c.bf16 %v218_v34, %v217_v33  ;;  %v641_v38 = vpack.c.bf16 %v220_v37, %v219_v36  ;;  %v221_v39 = vld [vmem:[#allocation7 + $0x40] sm:$0xff]  ;;  %v222_v40 = vld [vmem:[#allocation7 + $0x48] sm:$0xff]  ;;  %v223_v42 = vld [vmem:[#allocation7 + $0x50] sm:$0xff] }
  0x53   :  { %634 = vmatprep.subr.bf16.mxu1 %v817_v0  ;;  %v644_v41 = vpack.c.bf16 %v222_v40, %v221_v39  ;;  %v224_v43 = vld [vmem:[#allocation7 + $0x58] sm:$0xff]  ;;  %v225_v45 = vld [vmem:[#allocation7 + $0x60] sm:$0xff]  ;;  %v226_v46 = vld [vmem:[#allocation7 + $0x68] sm:$0xff] }
  0x54   :  { %v647_v44 = vpack.c.bf16 %v224_v43, %v223_v42  ;;  %v650_v47 = vpack.c.bf16 %v226_v46, %v225_v45  ;;  %v227_v48 = vld [vmem:[#allocation7 + $0x70] sm:$0xff]  ;;  %v228_v49 = vld [vmem:[#allocation7 + $0x78] sm:$0xff]  ;;  %v339_v23 = vld [vmem:[#allocation8] sm:$0xff] }
  0x55   :  { %615 = vmatpush3.bf16.msra.mxu0 %v614_v10  ;;  %v653_v50 = vpack.c.bf16 %v228_v49, %v227_v48  ;;  %v200_v10 = vshrl.u32 %v199_v9, 7  ;;  %v191_v11 = vld [vmem:[%s990_s2] sm:$0x1]  ;;  %v340_v24 = vld [vmem:[#allocation8 + $0x8] sm:$0xff]  ;;  %v343_v29 = vld [vmem:[#allocation8 + $0x20] sm:$0xff] }
  0x56   :  { %616 = vmatprep.subr.bf16.mxu0 %v817_v0  ;;  %636 = vmatpush3.bf16.msra.mxu1 %v635_v32  ;;  %v195_v15 = vld [vmem:[%s991_s3] sm:$0x1]  ;;  %v344_v30 = vld [vmem:[#allocation8 + $0x28] sm:$0xff]  ;;  %v345_v32 = vld [vmem:[#allocation8 + $0x30] sm:$0xff] }
  0x57   :  { %637 = vmatprep.subr.bf16.mxu1 %v817_v0  ;;  %v951_v12 = vsub.s32 0, %v200_v10  ;;  %v342_v27 = vld [vmem:[#allocation8 + $0x18] sm:$0xff]  ;;  %v662_v31 = vpack.c.bf16 %v344_v30, %v343_v29  ;;  %v348_v36 = vld [vmem:[#allocation8 + $0x48] sm:$0xff] }
  0x58   :  { %v346_v33 = vld [vmem:[#allocation8 + $0x38] sm:$0xff]  ;;  %v352_v42 = vld [vmem:[#allocation8 + $0x68] sm:$0xff] }
  0x59   :  { %618 = vmatpush3.bf16.msra.mxu0 %v617_v13  ;;  %v665_v34 = vpack.c.bf16 %v346_v33, %v345_v32  ;;  %v350_v39 = vld [vmem:[#allocation8 + $0x58] sm:$0xff] }
  0x5a   :  { %619 = vmatprep.subr.bf16.mxu0 %v817_v0  ;;  %639 = vmatpush3.bf16.msra.mxu1 %v638_v35  ;;  %v347_v35 = vld [vmem:[#allocation8 + $0x40] sm:$0xff]  ;;  %v354_v45 = vld [vmem:[#allocation8 + $0x78] sm:$0xff] }
  0x5b   :  { %640 = vmatprep.subr.bf16.mxu1 %v817_v0  ;;  %v668_v37 = vpack.c.bf16 %v348_v36, %v347_v35 }
  0x5d   :  { %621 = vmatpush3.bf16.msra.mxu0 %v620_v16 }
  0x5e   :  { %622 = vmatprep.subr.bf16.mxu0 %v817_v0  ;;  %642 = vmatpush3.bf16.msra.mxu1 %v641_v38  ;;  %v349_v38 = vld [vmem:[#allocation8 + $0x50] sm:$0xff] }
  0x5f   :  { %643 = vmatprep.subr.bf16.mxu1 %v817_v0  ;;  %v671_v40 = vpack.c.bf16 %v350_v39, %v349_v38 }
  0x61   :  { %624 = vmatpush3.bf16.msra.mxu0 %v623_v19 }
  0x62   :  { %625 = vmatprep.subr.bf16.mxu0 %v817_v0  ;;  %645 = vmatpush3.bf16.msra.mxu1 %v644_v41  ;;  %v351_v41 = vld [vmem:[#allocation8 + $0x60] sm:$0xff] }
  0x63   :  { %646 = vmatprep.subr.bf16.mxu1 %v817_v0  ;;  %v674_v43 = vpack.c.bf16 %v352_v42, %v351_v41 }
  0x65   :  { %627 = vmatpush3.bf16.msra.mxu0 %v626_v22 }
  0x66   :  { %628 = vmatprep.subr.bf16.mxu0 %v817_v0  ;;  %648 = vmatpush3.bf16.msra.mxu1 %v647_v44  ;;  %v353_v44 = vld [vmem:[#allocation8 + $0x70] sm:$0xff] }
  0x67   :  { %649 = vmatprep.subr.bf16.mxu1 %v817_v0  ;;  %v677_v46 = vpack.c.bf16 %v354_v45, %v353_v44 }
  0x69   :  { %630 = vmatpush3.bf16.msra.mxu0 %v629_v25  ;;  %v656_v25 = vpack.c.bf16 %v340_v24, %v339_v23 }
  0x6a   :  { %655 = vmatprep.subr.bf16.mxu0 %v817_v0  ;;  %651 = vmatpush3.bf16.msra.mxu1 %v650_v47 }
  0x6b   :  { %652 = vmatprep.subr.bf16.mxu1 %v817_v0 }
  0x6c   :  { %535 = vmatmul.mubr.f32.vlgmr.msra.gmra.mrb[0].mxu0 %v86_v26  ;;  %v341_v26 = vld [vmem:[#allocation8 + $0x10] sm:$0xff] }
  0x6d   :  { %604 = vmatprep.mubr.msk.f32.mxu0 %vm818_vm0, %v819_v1  ;;  %657 = vmatpush3.bf16.msra.mxu0 %v656_v25  ;;  %v659_v28 = vpack.c.bf16 %v342_v27, %v341_v26 }
  0x6e   :  { %654 = vmatpush3.bf16.msra.mxu1 %v653_v50  ;;  %658 = vmatprep.subr.bf16.mxu0 %v817_v0 }
  0x71   :  { %660 = vmatpush3.bf16.msra.mxu0 %v659_v28 }
  0x72   :  { %661 = vmatprep.subr.bf16.mxu0 %v817_v0 }
  0x75   :  { %663 = vmatpush3.bf16.msra.mxu0 %v662_v31 }
  0x76   :  { %664 = vmatprep.subr.bf16.mxu0 %v817_v0 }
  0x79   :  { %666 = vmatpush3.bf16.msra.mxu0 %v665_v34 }
  0x7a   :  { %667 = vmatprep.subr.bf16.mxu0 %v817_v0 }
  0x7d   :  { %669 = vmatpush3.bf16.msra.mxu0 %v668_v37 }
  0x7e   :  { %670 = vmatprep.subr.bf16.mxu0 %v817_v0 }
  0x81   :  { %672 = vmatpush3.bf16.msra.mxu0 %v671_v40 }
  0x82   :  { %673 = vmatprep.subr.bf16.mxu0 %v817_v0 }
  0x85   :  { %675 = vmatpush3.bf16.msra.mxu0 %v674_v43 }
  0x86   :  { %676 = vmatprep.subr.bf16.mxu0 %v817_v0 }
  0x89   :  { %678 = vmatpush3.bf16.msra.mxu0 %v677_v46 }
 0x13f   :  { %v169_v51 = vpop.f32.mrb[0].mxu0 }
 0x140   :  { %v173_v52 = vrot.slane %v169_v51, 4  ;;  %v179_v53 = vmul.f32 %v169_v51, %v169_v51  ;;  %v536_v54 = vpop.f32.mrb[1].mxu0 }
 0x142   :  { %v174_v55 = vadd.f32 %v173_v52, %v169_v51  ;;  %v180_v56 = vrot.slane %v179_v53, 4 }
 0x144   :  { %v175_v57 = vrot.slane %v174_v55, 2  ;;  %v181_v58 = vadd.f32 %v180_v56, %v179_v53 }
 0x146   :  { %v176_v59 = vadd.f32 %v175_v57, %v174_v55  ;;  %v182_v60 = vrot.slane %v181_v58, 2 }
 0x148   :  { %v177_v61 = vrot.slane %v176_v59, 1  ;;  %v183_v62 = vadd.f32 %v182_v60, %v181_v58 }
 0x14a   :  { %v178_v63 = vadd.f32 %v177_v61, %v176_v59  ;;  %v184_v1 = vrot.slane %v183_v62, 1 }
 0x14c   :  { %v185_v2 = vadd.f32 %v184_v1, %v183_v62  ;;  %v186_v3 = vmul.f32 0.125, %v178_v63 }
 0x14e   :  { %v187_v4 = vmul.f32 0.125, %v185_v2  ;;  %v188_v5 = vmul.f32 %v186_v3, %v186_v3 }
 0x150   :  { %v189_v6 = vsub.f32 %v187_v4, %v188_v5  ;;  %v317_v4 = vld [vmem:[%s993_s5] sm:$0x1]  ;;  %s820_s5 = smov [#allocation10]  }
 0x151   :  { %s439_s22 = sshll.u32 %s820_s5, 4  ;;  %s440_s22 = int_to_ptr.vmem [resolvable:$true] %s439_s22 }
 0x152   :  { %v190_v7 = vmax.f32 %v189_v6, 0.0  ;;  %p786_p5 = scmp.lt.s32.totalorder %s440_s22, %s440_s22 }
 0x154   :  { %v192_v8 = vadd.f32 1e-05, %v190_v7  ;;  %v321_v7 = vld [vmem:[%s994_s6] sm:$0x1]  ;;  %s781_s6 = scalar_lea.vmem %s440_s22, 128 }
 0x155   :  { %p782_p4 = scmp.ne.s32.totalorder %s440_s22, %s781_s6  ;;  %p787_p6 = scmp.lt.s32.totalorder %s781_s6, %s781_s6 }
 0x156   :  { %689 = vrsqrt.f32 %v192_v8 }
 0x157   :  { %p788_p7 = por %p787_p6, %p786_p5 }
 0x159   :  { %p789_p8 = pnand %p788_p7, %p782_p4 }
 0x160   :  { %v690_v13 = vpop.eup %689 }
 0x161   :  { %v194_v14 = vmul.f32 %v690_v13, %v191_v11 }
 0x163   :  { %v202_v16 = vrot.slane %v194_v14, %v951_v12  ;;  %v196_v17 = vmul.f32 %v194_v14, %v186_v3 }
 0x165   :  { %v197_v18 = vsub.f32 %v195_v15, %v196_v17  ;;  %v204_v19 = vmul.f32 %v202_v16, %v169_v51  ;;  %v450_v16 = vld [vmem:[%s996_s8] ss:$0 sm:$0xff] }
 0x167   :  { %v209_v20 = vrot.slane %v197_v18, %v951_v12 }
 0x169   :  { %v211_v21 = vadd.f32 %v209_v20, %v204_v19 }
 0x16b   :  { %v212_v22 = vmax.f32 %v211_v21, 0.0 }
 0x16d   :  { %570 = vmatmul.mubr.f32.vlgmr.msra.gmra.mrb[0].mxu1 %v212_v22 }
 0x240   :  { %v295_v47 = vpop.f32.mrb[0].mxu1 }
 0x241   :  { %v299_v48 = vrot.slane %v295_v47, 4  ;;  %v305_v49 = vmul.f32 %v295_v47, %v295_v47  ;;  %v571_v50 = vpop.f32.mrb[1].mxu1 }
 0x243   :  { %v300_v51 = vadd.f32 %v299_v48, %v295_v47  ;;  %v306_v52 = vrot.slane %v305_v49, 4 }
 0x245   :  { %v301_v53 = vrot.slane %v300_v51, 2  ;;  %v307_v54 = vadd.f32 %v306_v52, %v305_v49 }
 0x247   :  { %v302_v55 = vadd.f32 %v301_v53, %v300_v51  ;;  %v308_v56 = vrot.slane %v307_v54, 2 }
 0x249   :  { %v303_v57 = vrot.slane %v302_v55, 1  ;;  %v309_v58 = vadd.f32 %v308_v56, %v307_v54 }
 0x24b   :  { %v304_v59 = vadd.f32 %v303_v57, %v302_v55  ;;  %v310_v60 = vrot.slane %v309_v58, 1 }
 0x24d   :  { %v311_v61 = vadd.f32 %v310_v60, %v309_v58  ;;  %v312_v0 = vmul.f32 0.125, %v304_v59 }
 0x24f   :  { %v313_v62 = vmul.f32 0.125, %v311_v61  ;;  %v314_v63 = vmul.f32 %v312_v0, %v312_v0 }
 0x251   :  { %v315_v1 = vsub.f32 %v313_v62, %v314_v63 }
 0x253   :  { %v316_v2 = vmax.f32 %v315_v1, 0.0 }
 0x255   :  { %v318_v3 = vadd.f32 1e-05, %v316_v2 }
 0x257   :  { %691 = vrsqrt.f32 %v318_v3 }
 0x261   :  { %v692_v5 = vpop.eup %691 }
 0x262   :  { %v320_v6 = vmul.f32 %v692_v5, %v317_v4 }
 0x264   :  { %v322_v8 = vmul.f32 %v320_v6, %v312_v0  ;;  %v328_v9 = vrot.slane %v320_v6, %v951_v12 }
 0x266   :  { %v323_v10 = vsub.f32 %v321_v7, %v322_v8  ;;  %v330_v11 = vmul.f32 %v328_v9, %v295_v47 }
 0x268   :  { %v335_v13 = vrot.slane %v323_v10, %v951_v12 }
 0x26a   :  { %v337_v14 = vadd.f32 %v335_v13, %v330_v11 }
 0x26c   :  { %v338_v15 = vmax.f32 %v337_v14, 0.0 }
 0x26e   :  { %605 = vmatmul.mubr.f32.vlgmr.msra.gmra.mrb[2].mxu0 %v338_v15 }
 0x341   :  { %v428_v17 = vpop.f32.mrb[2].mxu0 }
 0x342   :  { %v429_v18 = vadd.f32 %v450_v16, %v428_v17  ;;  %v606_v19 = vpop.f32.mrb[3].mxu0 }
 0x344   :  { %432 = vst [vmem:[#allocation10] sm:$0xff] %v429_v18 }
 0x345   :  { %792 = shalt.err (!%p789_p8)
}
 0x346   :  { %s793_s0 = scalar_lea.hbm %s997_s9, 128 }
 0x347   :  { %p794_p9 = scmp.ne.s32.totalorder %s997_s9, %s793_s0  ;;  %p797_p10 = scmp.lt.u32.totalorder %s793_s0, %s997_s9 }
 0x349   :  { %p799_p11 = pnand %p797_p10, %p794_p9 }
 0x34b   :  { %802 = shalt.err (!%p799_p11)
}
 0x34c   :  { %442 = dma.vmem_to_hbm [thread:$0]  %s440_s22, 128, %s997_s9, [#allocation4]  }
 0x34d   :  { %809 = dma.done.wait [#allocation4], 128  }
 0x34e   :  { %810 = vsyncadd [#allocation4], 4294967168 }
 0x34f   :  { %446 = vsyncpa [#allocation3], 1 }
 0x350   :  { %447 = vsyncpa [#allocation6], 1 }
 0x351   :  { %448 = vsyncpa [#allocation9], 1 }
 0x352   :  { %449 = vsyncpa [#allocation4], 1 }

</bundles_post_ra>
